<compile_context>
chip_gen: v6e
topology: v6e:2x2x1
jax: 0.10.0
libtpu: 0.0.40
codegen_flags: <defaults>
</compile_context>

<pallas_src>
import jax
import jax.numpy as jnp
from jax import lax
from jax.experimental import pallas as pl
from jax.experimental.pallas import tpu as pltpu

LN_EPS = 1e-5  # PyTorch nn.LayerNorm default eps


# --------------------------------------------------------------------------
# Stage 1: LayerNorm over the embedding dimension (single invocation).
# --------------------------------------------------------------------------
def _layernorm_kernel(embed_ref, gamma_ref, beta_ref, nodevec_ref):
    x = embed_ref[...].astype(jnp.float32)                      # (N, E)
    mean = jnp.mean(x, axis=-1, keepdims=True)                  # (N, 1)
    centered = x - mean
    var = jnp.mean(centered * centered, axis=-1, keepdims=True)
    inv_std = lax.rsqrt(var + LN_EPS)
    nodevec = centered * inv_std
    nodevec = nodevec * gamma_ref[...] + beta_ref[...]          # (1, E) bcast
    nodevec_ref[...] = nodevec


def _layernorm(embed, gamma, beta):
    n, e = embed.shape
    return pl.pallas_call(
        _layernorm_kernel,
        out_shape=jax.ShapeDtypeStruct((n, e), jnp.float32),
        in_specs=[
            pl.BlockSpec((n, e), lambda: (0, 0)),
            pl.BlockSpec((1, e), lambda: (0, 0)),
            pl.BlockSpec((1, e), lambda: (0, 0)),
        ],
        out_specs=pl.BlockSpec((n, e), lambda: (0, 0)),
    )(embed, gamma, beta)


# --------------------------------------------------------------------------
# Stage 2: row-tiled adj = softmax(relu(nodevec @ nodevec^T), axis=-1)
# --------------------------------------------------------------------------
def _adjacency_kernel(q_ref, nodevec_ref, adj_ref):
    q = q_ref[...]                                              # (TQ, E) f32
    nv = nodevec_ref[...]                                       # (N,  E) f32 (resident)

    # scores[i, j] = sum_e q[i, e] * nv[j, e]  -- contract last dims directly,
    # no materialized transpose feeding the MXU.
    scores = lax.dot_general(
        q, nv,
        dimension_numbers=(((1,), (1,)), ((), ())),
        preferred_element_type=jnp.float32,
    )                                                           # (TQ, N)
    scores = jnp.maximum(scores, 0.0)                           # relu (VALU)

    # Row-wise softmax: exp on EUP, reciprocal on EUP (approx vrcp), scale on VALU.
    row_max = jnp.max(scores, axis=-1, keepdims=True)
    p = jnp.exp(scores - row_max)
    denom = jnp.sum(p, axis=-1, keepdims=True)
    adj_ref[...] = (p * pl.reciprocal(denom, approx=True)).astype(adj_ref.dtype)


def _choose_row_tile(n, e, budget_bytes=24 << 20):
    """Pick a query-row tile that keeps the pipelined VMEM footprint small
    enough to fit comfortably on v7x (64 MiB physical) with headroom."""
    if n <= 256:
        return n  # single block; block dims equal full array dims (always legal)
    tq = 512
    # 2x double-buffered (TQ,N) out + (TQ,E) in, plus resident (N,E) nodevec.
    while tq > 8 and (2 * tq * (n + e) * 4 + 2 * n * e * 4) > budget_bytes:
        tq //= 2
    return max(8, tq)


def graph_constructor_forward(embed, ln_weight, ln_bias):
    """embed: (N, E); ln_weight/ln_bias: (E,). Returns adj: (N, N) f32."""
    num_nodes, embed_dim = embed.shape
    gamma = ln_weight.reshape(1, embed_dim).astype(jnp.float32)
    beta = ln_bias.reshape(1, embed_dim).astype(jnp.float32)

    # Stage 1: LayerNorm once (f32 nodevec).
    nodevec = _layernorm(embed, gamma, beta)

    # Stage 2: row-tiled adjacency.
    tq = _choose_row_tile(num_nodes, embed_dim)
    grid = (pl.cdiv(num_nodes, tq),)

    adj = pl.pallas_call(
        _adjacency_kernel,
        out_shape=jax.ShapeDtypeStruct((num_nodes, num_nodes), jnp.float32),
        grid_spec=pltpu.PrefetchScalarGridSpec(
            num_scalar_prefetch=0,
            grid=grid,
            in_specs=[
                # query-row slab, pipelined over the grid
                pl.BlockSpec((tq, embed_dim), lambda i: (i, 0)),
                # full nodevec, resident (constant block index -> fetched once)
                pl.BlockSpec((num_nodes, embed_dim), lambda i: (0, 0)),
            ],
            out_specs=pl.BlockSpec((tq, num_nodes), lambda i: (i, 0)),
        ),
        compiler_params=pltpu.CompilerParams(
            dimension_semantics=("parallel",),  # v7x: shard row tiles across 2 TCs
        ),
    )(nodevec, nodevec)
    return adj


# --------------------------------------------------------------------------
# Pure-JAX reference (matches PyTorch semantics).
# --------------------------------------------------------------------------
def _reference(embed, ln_weight, ln_bias):
    x = embed.astype(jnp.float32)
    mean = jnp.mean(x, axis=-1, keepdims=True)
    var = jnp.mean((x - mean) ** 2, axis=-1, keepdims=True)
    nodevec = (x - mean) / jnp.sqrt(var + LN_EPS) * ln_weight + ln_bias
    adj = jnp.maximum(nodevec @ nodevec.T, 0.0)
    return jax.nn.softmax(adj, axis=-1)


if __name__ == "__main__":
    # Deterministic parameter init (nn.Parameter(randn) + default LayerNorm
    # init: weight=1, bias=0).
    num_nodes, embed_dim = 8, 32
    key = jax.random.PRNGKey(0)
    embed = jax.random.normal(key, (num_nodes, embed_dim), dtype=jnp.float32)
    ln_weight = jnp.ones((embed_dim,), dtype=jnp.float32)
    ln_bias = jnp.zeros((embed_dim,), dtype=jnp.float32)

    adj = graph_constructor_forward(embed, ln_weight, ln_bias)
    adj = jax.block_until_ready(adj)

    ref = _reference(embed, ln_weight, ln_bias)
    assert adj.shape == (num_nodes, num_nodes)
    # Tolerances loosened to cover the approx (EUP vrcp) softmax reciprocal.
    assert jnp.allclose(adj, ref, atol=2e-3, rtol=2e-3), "mismatch vs reference"
    assert jnp.allclose(jnp.sum(adj, axis=-1), 1.0, atol=2e-3), "rows must sum to 1"

    print("KERNEL_OK")
</pallas_src>

<mosaic_0001>
module attributes {stable_mosaic.version = 11 : i64} {
  func.func @_layernorm_kernel(%arg0: memref<8x32xf32, #tpu.memory_space<vmem>>, %arg1: memref<1x32xf32, #tpu.memory_space<vmem>>, %arg2: memref<1x32xf32, #tpu.memory_space<vmem>>, %arg3: memref<8x32xf32, #tpu.memory_space<vmem>>) attributes {dimension_semantics = [], scalar_prefetch = 0 : i64, scratch_operands = 0 : i64, tpu.core_type = #tpu.core_type<tc>} {
    %c0 = arith.constant 0 : index
    %c0_0 = arith.constant 0 : index
    %0 = vector.load %arg0[%c0, %c0_0] : memref<8x32xf32, #tpu.memory_space<vmem>>, vector<8x32xf32>
    %cst = arith.constant dense<0.000000e+00> : vector<8xf32>
    %1 = vector.multi_reduction <add>, %0, %cst [1] : vector<8x32xf32> to vector<8xf32>
    %2 = vector.shape_cast %1 : vector<8xf32> to vector<8x1xf32>
    %cst_1 = arith.constant 3.200000e+01 : f32
    %3 = vector.broadcast %cst_1 : f32 to vector<8x1xf32>
    %4 = arith.divf %2, %3 : vector<8x1xf32>
    %5 = vector.broadcast %4 : vector<8x1xf32> to vector<8x32xf32>
    %6 = arith.subf %0, %5 : vector<8x32xf32>
    %7 = arith.mulf %6, %6 : vector<8x32xf32>
    %cst_2 = arith.constant dense<0.000000e+00> : vector<8xf32>
    %8 = vector.multi_reduction <add>, %7, %cst_2 [1] : vector<8x32xf32> to vector<8xf32>
    %9 = vector.shape_cast %8 : vector<8xf32> to vector<8x1xf32>
    %cst_3 = arith.constant 3.200000e+01 : f32
    %10 = vector.broadcast %cst_3 : f32 to vector<8x1xf32>
    %11 = arith.divf %9, %10 : vector<8x1xf32>
    %cst_4 = arith.constant 9.99999974E-6 : f32
    %12 = vector.broadcast %cst_4 : f32 to vector<8x1xf32>
    %13 = arith.addf %11, %12 : vector<8x1xf32>
    %14 = math.rsqrt %13 : vector<8x1xf32>
    %15 = vector.broadcast %14 : vector<8x1xf32> to vector<8x32xf32>
    %16 = arith.mulf %6, %15 : vector<8x32xf32>
    %c0_5 = arith.constant 0 : index
    %c0_6 = arith.constant 0 : index
    %17 = vector.load %arg1[%c0_5, %c0_6] : memref<1x32xf32, #tpu.memory_space<vmem>>, vector<1x32xf32>
    %18 = vector.broadcast %17 : vector<1x32xf32> to vector<8x32xf32>
    %19 = arith.mulf %16, %18 : vector<8x32xf32>
    %c0_7 = arith.constant 0 : index
    %c0_8 = arith.constant 0 : index
    %20 = vector.load %arg2[%c0_7, %c0_8] : memref<1x32xf32, #tpu.memory_space<vmem>>, vector<1x32xf32>
    %21 = vector.broadcast %20 : vector<1x32xf32> to vector<8x32xf32>
    %22 = arith.addf %19, %21 : vector<8x32xf32>
    %c0_9 = arith.constant 0 : index
    %c0_10 = arith.constant 0 : index
    %23 = vector.load %arg3[%c0_9, %c0_10] : memref<8x32xf32, #tpu.memory_space<vmem>>, vector<8x32xf32>
    tpu.vector_store %arg3[%c0_9, %c0_10], %22 {strides = array<i32>} : memref<8x32xf32, #tpu.memory_space<vmem>>, vector<8x32xf32>,
    return
  }
}

</mosaic_0001>

<bundles_post_ra>
// kernel: tpu_custom_call.1
= control target key start
LH: loop header
LB: loop body
LE: loop exit
PB: predicated region body
PF: predicated region fallthrough
CT: control target
= control target key end

     0   :  { %8 = vsyncpa [#allocation3], 0  ;;  %s162_s0 = inlined_call_operand.hbm [shape: f32[8,32], index: 0, kind: input, shape index: {}]   ;;  %s163_s1 = inlined_call_operand.vmem [shape: f32[1,32], index: 1, kind: input, shape index: {}]   ;;  %s164_s2 = inlined_call_operand.vmem [shape: f32[1,32], index: 2, kind: input, shape index: {}]   ;;  %s165_s3 = inlined_call_operand.hbm [shape: f32[8,32], index: 3, kind: output, shape index: {}]  }
   0x1   :  { %9 = vsyncpa [#allocation4], 0  ;;  %s125_s12 = smov [#allocation2]  }
   0x2   :  { %s16_s13 = sshll.u32 %s125_s12, 4  ;;  %s17_s13 = int_to_ptr.vmem [resolvable:$true] %s16_s13 }
   0x3   :  { %s89_s14 = scalar_lea.vmem %s17_s13, 128  ;;  %p94_p1 = scmp.lt.s32.totalorder %s17_s13, %s17_s13 }
   0x4   :  { %p90_p0 = scmp.ne.s32.totalorder %s17_s13, %s89_s14  ;;  %p95_p2 = scmp.lt.s32.totalorder %s89_s14, %s89_s14 }
   0x6   :  { %p96_p3 = por %p95_p2, %p94_p1 }
   0x8   :  { %p97_p4 = pnand %p96_p3, %p90_p0 }
   0xa   :  { %100 = shalt.err (!%p97_p4)
}
   0xb   :  { %19 = dma.hbm_to_vmem [thread:$0]  %s162_s0, 128, %s17_s13, [#allocation3]  }
   0xc   :  { %121 = dma.done.wait [#allocation3], 128  }
   0xd   :  { %122 = vsyncadd [#allocation3], 4294967168  ;;  %vm28_vm0 = vcmask 261120   ;;  %v27_v0 = vld [vmem:[#allocation2] sm:$0xff]  ;;  %s126_s20 = smov [#allocation5]  }
   0xe   :  { %v29_v1 = vsel %vm28_vm0, %v27_v0, 0.0  ;;  %v75_v11 = vld [vmem:[%s163_s1] ss:$0 sm:$0xff]  ;;  %s66_s21 = sshll.u32 %s126_s20, 4  ;;  %s67_s21 = int_to_ptr.vmem [resolvable:$true] %s66_s21 }
   0xf   :  { %30 = vadd.xlane.f32.xlu0 %v29_v1  ;;  %v76_v13 = vld [vmem:[%s164_s2] ss:$0 sm:$0xff]  ;;  %s101_s22 = scalar_lea.vmem %s67_s21, 128  ;;  %p106_p6 = scmp.lt.s32.totalorder %s67_s21, %s67_s21 }
  0x10   :  { %p102_p5 = scmp.ne.s32.totalorder %s67_s21, %s101_s22  ;;  %p107_p7 = scmp.lt.s32.totalorder %s101_s22, %s101_s22 }
  0x12   :  { %p108_p8 = por %p107_p7, %p106_p6 }
  0x14   :  { %p109_p9 = pnand %p108_p8, %p102_p5 }
  0x98   :  { %v31_v2 = vpop.xlane.xlu0 %30 }
  0x99   :  { %v33_v3 = vmul.f32 0.03125, %v31_v2 }
  0x9b   :  { %v34_v4 = vsub.f32 %v27_v0, %v33_v3 }
  0x9d   :  { %v35_v5 = vmul.f32 %v34_v4, %v34_v4 }
  0x9f   :  { %v36_v6 = vsel %vm28_vm0, %v35_v5, 0.0 }
  0xa0   :  { %37 = vadd.xlane.f32.xlu0 %v36_v6 }
 0x129   :  { %v38_v7 = vpop.xlane.xlu0 %37 }
 0x12a   :  { %v39_v8 = vmul.f32 0.03125, %v38_v7 }
 0x12c   :  { %v40_v9 = vadd.f32 1e-05, %v39_v8 }
 0x12e   :  { %79 = vrsqrt.f32 %v40_v9 }
 0x13b   :  { %v80_v10 = vpop.eup %79 }
 0x13c   :  { %v42_v12 = vmul.f32 %v80_v10, %v34_v4 }
 0x13e   :  { %v50_v14 = vmul.f32 %v75_v11, %v42_v12 }
 0x140   :  { %v58_v15 = vadd.f32 %v76_v13, %v50_v14 }
 0x142   :  { %59 = vst.msk [vmem:[#allocation5] sm:$0xff] %vm28_vm0, %v58_v15 }
 0x143   :  { %112 = shalt.err (!%p109_p9)
}
 0x144   :  { %69 = dma.vmem_to_hbm [thread:$0]  %s67_s21, 128, %s165_s3, [#allocation4]  }
 0x145   :  { %123 = dma.done.wait [#allocation4], 128  }
 0x146   :  { %124 = vsyncadd [#allocation4], 4294967168 }
 0x147   :  { %73 = vsyncpa [#allocation3], 1 }
 0x148   :  { %74 = vsyncpa [#allocation4], 1 }

</bundles_post_ra>
